<compile_context>
chip_gen: v7x
topology: tpu7x:2x2x1
jax: 0.10.0
libtpu: 0.0.40
codegen_flags: <defaults>
</compile_context>

<pallas_src>
import jax
import jax.numpy as jnp
from jax import lax
from jax.experimental import pallas as pl
from jax.experimental.pallas import tpu as pltpu

HIDDEN = 64
NUM_CLASSES = 6
OUT_PAD = 8          # classes padded 6 -> 8 for the HBM output width
BN_EPS = 1e-5
LEAKY_SLOPE = 0.01


def _round_up(a, b):
    return (a + b - 1) // b * b


# ---------------------------------------------------------------------------
# Pallas kernels (two logical rows packed per 128-lane row)
# ---------------------------------------------------------------------------
def _split_coords(x):
    """x: (tb, 4) = [x_{2r,0}, x_{2r,1}, x_{2r+1,0}, x_{2r+1,1}] per packed row.

    Returns (c0, c1) of shape (tb, 128): coordinate 0/1 of row 2r in lanes 0..63
    and of row 2r+1 in lanes 64..127.
    """
    tb = x.shape[0]
    lane = lax.broadcasted_iota(jnp.int32, (tb, 2 * HIDDEN), 1)
    lo = lane < HIDDEN
    c0 = jnp.where(lo, x[:, 0:1], x[:, 2:3])
    c1 = jnp.where(lo, x[:, 1:2], x[:, 3:4])
    return c0, c1


def _feat_kernel(x_ref, w_ref, b_ref, o_ref):
    """y = LeakyReLU(x @ W' + b') with BN folded; two rows per 128-lane output row.

    x_ref: (tb, 4)  w_ref: (2, 128) [= concat(W', W')]  b_ref: (1, 128)
    o_ref: (tb, 128)  lanes 0..63 -> logical row 2r, lanes 64..127 -> row 2r+1.
    """
    c0, c1 = _split_coords(x_ref[...])
    y = c0 * w_ref[0:1, :] + c1 * w_ref[1:2, :] + b_ref[...]
    o_ref[...] = jnp.maximum(y, LEAKY_SLOPE * y).astype(o_ref.dtype)


def _logits_kernel(x_ref, w1_ref, b1_ref, w2_ref, b2_ref, o_ref):
    """Fused logits path; the (N, 64) hidden activation never round-trips to HBM.

    x_ref: (tb, 4)  w1_ref: (2, 128)  b1_ref: (1, 128)
    w2_ref: (128, 16) block-diagonal [[W2p, 0], [0, W2p]] with W2p = (64, 8)
    b2_ref: (1, 16) = concat(b2p, b2p)
    o_ref: (tb, 16): cols 0..7 -> logits of row 2r, cols 8..15 -> row 2r+1.
    """
    c0, c1 = _split_coords(x_ref[...])
    h = c0 * w1_ref[0:1, :] + c1 * w1_ref[1:2, :] + b1_ref[...]
    h = jnp.maximum(h, LEAKY_SLOPE * h)
    y = jnp.dot(h, w2_ref[...], preferred_element_type=jnp.float32) + b2_ref[...]
    o_ref[...] = y.astype(o_ref.dtype)


# ---------------------------------------------------------------------------
# Wrapper
# ---------------------------------------------------------------------------
def hand_ann_forward(x, params, output_feature=True, tile_n=8192):
    """Pallas implementation of Hand_ANN.forward (eval mode).

    x: (B, F, 2) float32.  Returns (B, F, 64) if output_feature else (B, F, num_classes).
    """
    B, F, D = x.shape
    N = B * F
    xf = x.reshape(N, D).astype(jnp.float32)

    # Fold BatchNorm1d (eval mode) + Linear bias into a single weight/bias.
    scale = params["bn_gamma"] / jnp.sqrt(params["bn_running_var"] + BN_EPS)
    shift = params["bn_beta"] - params["bn_running_mean"] * scale
    w1 = params["lin_w"].T * scale[None, :]                    # (2, 64)
    b1 = (params["lin_b"] * scale + shift).reshape(1, HIDDEN)  # (1, 64)
    # Replicate across both lane-halves (two logical rows share one 128-lane row).
    w1p = jnp.concatenate([w1, w1], axis=1)                    # (2, 128)
    b1p = jnp.concatenate([b1, b1], axis=1)                    # (1, 128)

    # Row tiling: t rows per grid step; 2 rows packed per output row => t % 16 == 0.
    n16 = _round_up(max(N, 1), 16)
    t = min(_round_up(tile_n, 16), n16)
    # v7x megacore: the "parallel" axis only shards across both TensorCores with
    # >= 2 grid steps, so split single-tile problems that are big enough.
    if n16 >= 32 and n16 <= t:
        t = _round_up((N + 1) // 2, 16)
    n_pad = _round_up(N, t)
    if n_pad != N:
        xf = jnp.pad(xf, ((0, n_pad - N), (0, 0)))
    xp = xf.reshape(n_pad // 2, 2 * D)    # contiguous two-rows-per-row view (free)
    tb = t // 2
    grid = (n_pad // t,)

    cparams = pltpu.CompilerParams(
        dimension_semantics=("parallel",),
        # Big tiles need > v5e's 16 MiB default scoped VMEM; 48 MiB still fits
        # comfortably under v7x's 64 MiB physical VMEM.
        vmem_limit_bytes=48 * 1024 * 1024,
    )

    if output_feature:
        feat = pl.pallas_call(
            _feat_kernel,
            out_shape=jax.ShapeDtypeStruct((n_pad // 2, 2 * HIDDEN), jnp.float32),
            grid=grid,
            in_specs=[
                pl.BlockSpec((tb, 2 * D), lambda i: (i, 0)),
                pl.BlockSpec((D, 2 * HIDDEN), lambda i: (0, 0)),
                pl.BlockSpec((1, 2 * HIDDEN), lambda i: (0, 0)),
            ],
            out_specs=pl.BlockSpec((tb, 2 * HIDDEN), lambda i: (i, 0)),
            compiler_params=cparams,
        )(xp, w1p, b1p)
        return feat.reshape(n_pad, HIDDEN)[:N].reshape(B, F, HIDDEN)

    # Logits head: pad classes 6 -> 8, block-diagonal (128, 16) so both packed rows
    # go through one MXU contraction; HBM output is only 16 f32 lanes per packed row.
    w2p = jnp.zeros((HIDDEN, OUT_PAD), jnp.float32).at[:, :NUM_CLASSES].set(params["out_w"].T)
    b2p = jnp.zeros((OUT_PAD,), jnp.float32).at[:NUM_CLASSES].set(params["out_b"])
    w2bd = jnp.zeros((2 * HIDDEN, 2 * OUT_PAD), jnp.float32)
    w2bd = w2bd.at[:HIDDEN, :OUT_PAD].set(w2p).at[HIDDEN:, OUT_PAD:].set(w2p)
    b2bd = jnp.concatenate([b2p, b2p]).reshape(1, 2 * OUT_PAD)

    logits = pl.pallas_call(
        _logits_kernel,
        out_shape=jax.ShapeDtypeStruct((n_pad // 2, 2 * OUT_PAD), jnp.float32),
        grid=grid,
        in_specs=[
            pl.BlockSpec((tb, 2 * D), lambda i: (i, 0)),
            pl.BlockSpec((D, 2 * HIDDEN), lambda i: (0, 0)),
            pl.BlockSpec((1, 2 * HIDDEN), lambda i: (0, 0)),
            pl.BlockSpec((2 * HIDDEN, 2 * OUT_PAD), lambda i: (0, 0)),
            pl.BlockSpec((1, 2 * OUT_PAD), lambda i: (0, 0)),
        ],
        out_specs=pl.BlockSpec((tb, 2 * OUT_PAD), lambda i: (i, 0)),
        compiler_params=cparams,
    )(xp, w1p, b1p, w2bd, b2bd)
    return logits.reshape(n_pad, OUT_PAD)[:N, :NUM_CLASSES].reshape(B, F, NUM_CLASSES)


# ---------------------------------------------------------------------------
# Deterministic parameter init (shapes from Hand_ANN.__init__)
# ---------------------------------------------------------------------------
def init_params(key):
    ks = jax.random.split(key, 8)
    lin_w = jax.random.uniform(ks[0], (HIDDEN, 2), jnp.float32, -0.7, 0.7)
    lin_b = jax.random.uniform(ks[1], (HIDDEN,), jnp.float32, -0.7, 0.7)
    bn_gamma = jax.random.uniform(ks[2], (HIDDEN,), jnp.float32, 0.5, 1.5)
    bn_beta = jax.random.uniform(ks[3], (HIDDEN,), jnp.float32, -0.3, 0.3)
    bn_running_mean = jax.random.uniform(ks[4], (HIDDEN,), jnp.float32, -0.2, 0.2)
    bn_running_var = jax.random.uniform(ks[5], (HIDDEN,), jnp.float32, 0.5, 1.5)
    out_w = jax.random.uniform(ks[6], (NUM_CLASSES, HIDDEN), jnp.float32, -0.12, 0.12)
    out_b = jax.random.uniform(ks[7], (NUM_CLASSES,), jnp.float32, -0.12, 0.12)
    return dict(
        lin_w=lin_w, lin_b=lin_b,
        bn_gamma=bn_gamma, bn_beta=bn_beta,
        bn_running_mean=bn_running_mean, bn_running_var=bn_running_var,
        out_w=out_w, out_b=out_b,
    )


def reference_forward(x, params, output_feature=True):
    """Pure-JAX reference matching the PyTorch forward (eval mode)."""
    B, F, D = x.shape
    xf = x.reshape(B * F, D)
    y = xf @ params["lin_w"].T + params["lin_b"]
    scale = params["bn_gamma"] / jnp.sqrt(params["bn_running_var"] + BN_EPS)
    y = (y - params["bn_running_mean"]) * scale + params["bn_beta"]
    y = jnp.where(y > 0, y, LEAKY_SLOPE * y)
    lin = y.reshape(B, F, HIDDEN)
    if output_feature:
        return lin
    return lin @ params["out_w"].T + params["out_b"]


if __name__ == "__main__":
    key = jax.random.PRNGKey(0)
    pkey, xkey1, xkey2, xkey3 = jax.random.split(key, 4)
    params = init_params(pkey)

    # Case 1: (batch=2, framelength=8, coords=2) -> N=16 (16-aligned, single step)
    x1 = jax.random.normal(xkey1, (2, 8, 2), dtype=jnp.float32)
    feat1 = jax.block_until_ready(hand_ann_forward(x1, params, output_feature=True))
    logits1 = jax.block_until_ready(hand_ann_forward(x1, params, output_feature=False))
    assert feat1.shape == (2, 8, HIDDEN)
    assert logits1.shape == (2, 8, NUM_CLASSES)
    assert jnp.allclose(feat1, reference_forward(x1, params, True), atol=1e-5, rtol=1e-5)
    assert jnp.allclose(logits1, reference_forward(x1, params, False), atol=1e-5, rtol=1e-5)

    # Case 2: (batch=3, framelength=5, coords=2) -> N=15 (exercises row padding / tail)
    x2 = jax.random.normal(xkey2, (3, 5, 2), dtype=jnp.float32)
    feat2 = jax.block_until_ready(hand_ann_forward(x2, params, output_feature=True))
    logits2 = jax.block_until_ready(hand_ann_forward(x2, params, output_feature=False))
    assert feat2.shape == (3, 5, HIDDEN)
    assert logits2.shape == (3, 5, NUM_CLASSES)
    assert jnp.allclose(feat2, reference_forward(x2, params, True), atol=1e-5, rtol=1e-5)
    assert jnp.allclose(logits2, reference_forward(x2, params, False), atol=1e-5, rtol=1e-5)

    # Case 3: (batch=4, framelength=50, coords=2) -> N=200 (multi-step grid + padding)
    x3 = jax.random.normal(xkey3, (4, 50, 2), dtype=jnp.float32)
    feat3 = jax.block_until_ready(hand_ann_forward(x3, params, output_feature=True))
    logits3 = jax.block_until_ready(hand_ann_forward(x3, params, output_feature=False))
    assert feat3.shape == (4, 50, HIDDEN)
    assert logits3.shape == (4, 50, NUM_CLASSES)
    assert jnp.allclose(feat3, reference_forward(x3, params, True), atol=1e-5, rtol=1e-5)
    assert jnp.allclose(logits3, reference_forward(x3, params, False), atol=1e-5, rtol=1e-5)

    print("KERNEL_OK")
</pallas_src>

<mosaic_0001>
module attributes {stable_mosaic.version = 11 : i64} {
  func.func @_feat_kernel(%arg0: i32, %arg1: memref<8x4xf32, #tpu.memory_space<vmem>>, %arg2: memref<2x128xf32, #tpu.memory_space<vmem>>, %arg3: memref<1x128xf32, #tpu.memory_space<vmem>>, %arg4: memref<8x128xf32, #tpu.memory_space<vmem>>) attributes {dimension_semantics = [#tpu.dimension_semantics<parallel>], iteration_bounds = array<i64: 1>, scalar_prefetch = 0 : i64, scratch_operands = 0 : i64, tpu.core_type = #tpu.core_type<tc>, window_params = [{transform_indices = @transform_0, window_bounds = array<i64: 8, 4>}, {pipeline_mode = #tpu.pipeline_mode<synchronous>, transform_indices = @transform_1, window_bounds = array<i64: 2, 128>}, {pipeline_mode = #tpu.pipeline_mode<synchronous>, transform_indices = @transform_2, window_bounds = array<i64: 1, 128>}, {transform_indices = @transform_3, window_bounds = array<i64: 8, 128>}]} {
    %c0 = arith.constant 0 : index
    %c0_0 = arith.constant 0 : index
    %0 = vector.load %arg1[%c0, %c0_0] : memref<8x4xf32, #tpu.memory_space<vmem>>, vector<8x4xf32>
    %1 = tpu.iota {dimensions = array<i32: 1>} : vector<8x128xi32>
    %c64_i32 = arith.constant 64 : i32
    %2 = vector.broadcast %c64_i32 : i32 to vector<8x128xi32>
    %3 = arith.cmpi slt, %1, %2 : vector<8x128xi32>
    %4 = vector.extract_strided_slice %0 {offsets = [0, 0], sizes = [8, 1], strides = [1, 1]} : vector<8x4xf32> to vector<8x1xf32>
    %5 = vector.extract_strided_slice %0 {offsets = [0, 2], sizes = [8, 1], strides = [1, 1]} : vector<8x4xf32> to vector<8x1xf32>
    %6 = vector.shape_cast %4 : vector<8x1xf32> to vector<8x1xf32>
    %7 = vector.broadcast %6 : vector<8x1xf32> to vector<8x128xf32>
    %8 = vector.shape_cast %5 : vector<8x1xf32> to vector<8x1xf32>
    %9 = vector.broadcast %8 : vector<8x1xf32> to vector<8x128xf32>
    %10 = arith.select %3, %7, %9 : vector<8x128xi1>, vector<8x128xf32>
    %11 = vector.extract_strided_slice %0 {offsets = [0, 1], sizes = [8, 1], strides = [1, 1]} : vector<8x4xf32> to vector<8x1xf32>
    %12 = vector.extract_strided_slice %0 {offsets = [0, 3], sizes = [8, 1], strides = [1, 1]} : vector<8x4xf32> to vector<8x1xf32>
    %13 = vector.shape_cast %11 : vector<8x1xf32> to vector<8x1xf32>
    %14 = vector.broadcast %13 : vector<8x1xf32> to vector<8x128xf32>
    %15 = vector.shape_cast %12 : vector<8x1xf32> to vector<8x1xf32>
    %16 = vector.broadcast %15 : vector<8x1xf32> to vector<8x128xf32>
    %17 = arith.select %3, %14, %16 : vector<8x128xi1>, vector<8x128xf32>
    %c0_1 = arith.constant 0 : index
    %c0_2 = arith.constant 0 : index
    %18 = vector.load %arg2[%c0_1, %c0_2] : memref<2x128xf32, #tpu.memory_space<vmem>>, vector<1x128xf32>
    %19 = vector.broadcast %18 : vector<1x128xf32> to vector<8x128xf32>
    %20 = arith.mulf %10, %19 : vector<8x128xf32>
    %c1 = arith.constant 1 : index
    %c0_3 = arith.constant 0 : index
    %21 = vector.load %arg2[%c1, %c0_3] : memref<2x128xf32, #tpu.memory_space<vmem>>, vector<1x128xf32>
    %22 = vector.broadcast %21 : vector<1x128xf32> to vector<8x128xf32>
    %23 = arith.mulf %17, %22 : vector<8x128xf32>
    %24 = arith.addf %20, %23 : vector<8x128xf32>
    %c0_4 = arith.constant 0 : index
    %c0_5 = arith.constant 0 : index
    %25 = vector.load %arg3[%c0_4, %c0_5] : memref<1x128xf32, #tpu.memory_space<vmem>>, vector<1x128xf32>
    %26 = vector.broadcast %25 : vector<1x128xf32> to vector<8x128xf32>
    %27 = arith.addf %24, %26 : vector<8x128xf32>
    %cst = arith.constant 0.00999999977 : f32
    %28 = vector.broadcast %cst : f32 to vector<8x128xf32>
    %29 = arith.mulf %28, %27 : vector<8x128xf32>
    %30 = arith.maximumf %27, %29 : vector<8x128xf32>
    %c0_6 = arith.constant 0 : index
    %c0_7 = arith.constant 0 : index
    %31 = vector.load %arg4[%c0_6, %c0_7] : memref<8x128xf32, #tpu.memory_space<vmem>>, vector<8x128xf32>
    tpu.vector_store %arg4[%c0_6, %c0_7], %30 {strides = array<i32>} : memref<8x128xf32, #tpu.memory_space<vmem>>, vector<8x128xf32>,
    return
  }
  func.func @transform_0(%arg0: i32) -> (i32, i32) {
    %c0_i32 = arith.constant 0 : i32
    %c0_i32_0 = arith.constant 0 : i32
    return %arg0, %c0_i32 : i32, i32
  }
  func.func @transform_1(%arg0: i32) -> (i32, i32) {
    %c0_i32 = arith.constant 0 : i32
    %c0_i32_0 = arith.constant 0 : i32
    %c0_i32_1 = arith.constant 0 : i32
    return %c0_i32, %c0_i32_0 : i32, i32
  }
  func.func @transform_2(%arg0: i32) -> (i32, i32) {
    %c0_i32 = arith.constant 0 : i32
    %c0_i32_0 = arith.constant 0 : i32
    %c0_i32_1 = arith.constant 0 : i32
    return %c0_i32, %c0_i32_0 : i32, i32
  }
  func.func @transform_3(%arg0: i32) -> (i32, i32) {
    %c0_i32 = arith.constant 0 : i32
    %c0_i32_0 = arith.constant 0 : i32
    return %arg0, %c0_i32 : i32, i32
  }
}

</mosaic_0001>

<bundles_post_ra>
// kernel: tpu_custom_call.1
= control target key start
LH: loop header
LB: loop body
LE: loop exit
PB: predicated region body
PF: predicated region fallthrough
CT: control target
= control target key end

     0   :  { %v113_v1 = vmov 1   ;;  %v114_v2 = vmov 0   ;;  %s162_s0 = inlined_call_operand.vmem [shape: f32[8,4], index: 0, kind: input, shape index: {}]   ;;  %s163_s1 = inlined_call_operand.vmem [shape: f32[2,128], index: 1, kind: input, shape index: {}]   ;;  %s164_s2 = inlined_call_operand.vmem [shape: f32[1,128], index: 2, kind: input, shape index: {}]   ;;  %s165_s3 = inlined_call_operand.hbm [shape: f32[8,128], index: 3, kind: output, shape index: {}]  }
   0x1   :  { %v15_v0 = vld [vmem:[%s162_s0] sm:$0xff]  ;;  %86 = vset.pattern.permute.xlu1 %v113_v1  ;;  %84 = vset.pattern.permute.xlu0 %v114_v2 }
   0x2   :  { %8 = vsyncpa [#allocation3], 0  ;;  %30 = vperm.xlu1 %86, %v15_v0   ;;  %21 = vperm.xlu0 %84, %v15_v0   ;;  %v115_v3 = vmov 3   ;;  %v116_v4 = vmov 2   ;;  %v16_v5 = vlaneseq  ;;  %v77_v9 = vld [vmem:[%s163_s1 + $0x1] ss:$0 sm:$0xff] }
   0x3   :  { %v76_v10 = vld [vmem:[%s163_s1] ss:$0 sm:$0xff]  ;;  %s117_s19 = smov [#allocation2]  }
   0x4   :  { %v17_v6 = vand.u32 127, %v16_v5  ;;  %v78_v17 = vld [vmem:[%s164_s2] ss:$0 sm:$0xff]  ;;  %s68_s20 = sshll.u32 %s117_s19, 4  ;;  %s69_s20 = int_to_ptr.vmem [resolvable:$true] %s68_s20 }
   0x5   :  { %s89_s21 = scalar_lea.vmem %s69_s20, 128  ;;  %p94_p1 = scmp.lt.s32.totalorder %s69_s20, %s69_s20 }
   0x6   :  { %87 = vset.pattern.permute.xlu1 %v115_v3  ;;  %85 = vset.pattern.permute.xlu0 %v116_v4  ;;  %vm18_vm0 = vcmp.lt.s32.totalorder %v17_v6, 64  ;;  %p90_p0 = scmp.ne.s32.totalorder %s69_s20, %s89_s21  ;;  %p95_p2 = scmp.lt.s32.totalorder %s89_s21, %s89_s21 }
   0x7   :  { %34 = vperm.xlu1 %87, %v15_v0   ;;  %25 = vperm.xlu0 %85, %v15_v0  }
   0x8   :  { %p96_p3 = por %p95_p2, %p94_p1 }
   0xa   :  { %p97_p4 = pnand %p96_p3, %p90_p0 }
   0xb   :  { %88 = vset.pattern.permute.xlu0 %v115_v3 }
  0x81   :  { %v31_v7 = vpop.permute.xlu1 %30  ;;  %v22_v8 = vpop.permute.xlu0 %21 }
  0x86   :  { %v35_v11 = vpop.permute.xlu1 %34  ;;  %v26_v12 = vpop.permute.xlu0 %25 }
  0x87   :  { %v37_v13 = vsel %vm18_vm0, %v31_v7, %v35_v11  ;;  %v28_v14 = vsel %vm18_vm0, %v22_v8, %v26_v12 }
  0x88   :  { %v49_v15 = vmul.f32 %v77_v9, %v37_v13  ;;  %v43_v16 = vmul.f32 %v76_v10, %v28_v14 }
  0x8a   :  { %v50_v18 = vadd.f32 %v49_v15, %v43_v16 }
  0x8c   :  { %v58_v19 = vadd.f32 %v78_v17, %v50_v18 }
  0x8e   :  { %v59_v20 = vmul.f32 0.01, %v58_v19 }
  0x90   :  { %v60_v21 = vmax.f32 %v58_v19, %v59_v20 }
  0x92   :  { %61 = vst [vmem:[#allocation2] sm:$0xff] %v60_v21 }
  0x93   :  { %100 = shalt.err (!%p97_p4)
}
  0x94   :  { %s101_s23 = scalar_lea.hbm %s165_s3, 128 }
  0x95   :  { %p102_p5 = scmp.ne.s32.totalorder %s165_s3, %s101_s23  ;;  %p105_p6 = scmp.lt.u32.totalorder %s101_s23, %s165_s3 }
  0x97   :  { %p107_p7 = pnand %p105_p6, %p102_p5 }
  0x99   :  { %110 = shalt.err (!%p107_p7)
}
  0x9a   :  { %71 = dma.vmem_to_hbm [thread:$0]  %s69_s20, 128, %s165_s3, [#allocation3]  }
  0x9b   :  { %111 = dma.done.wait [#allocation3], 128  }
  0x9c   :  { %112 = vsyncadd [#allocation3], 4294967168 }
  0x9d   :  { %75 = vsyncpa [#allocation3], 1 }

</bundles_post_ra>
